<compile_context>
chip_gen: v7x
topology: tpu7x:2x2x1
jax: 0.10.0
libtpu: 0.0.40
codegen_flags: <defaults>
</compile_context>

<pallas_src>
import jax
import jax.numpy as jnp
from jax import lax
from jax.experimental import pallas as pl
from jax.experimental.pallas import tpu as pltpu


# ----------------------------- Pallas kernels ------------------------------

def prologue_kernel(patches_ref, cw_ref, cb_ref, fcw_ref, g2_ref, b2_ref,
                    z_ref):
    """Fused bn0+conv+relu+fc+bn2+relu.

    patches: (K, B, P) VMEM  -- tap-shifted windows of the stacked image
    cw:      (C, K)   SMEM  -- conv weights with bn0 scale folded in
    cb:      (C,)     SMEM  -- conv bias with bn0 shift folded in
    fcw:     (C, P, E) VMEM -- fc weights regrouped per conv channel
    g2/b2:   (1, E)   VMEM  -- folded bn2 scale / (bn2 shift + fc_bias*scale)
    z:       (B, E)   VMEM out
    """
    K = patches_ref.shape[0]
    C = fcw_ref.shape[0]
    B, E = z_ref.shape

    acc = jnp.zeros((B, E), jnp.float32)
    for c in range(C):
        # conv channel c: K shifted MACs on the VPU (1 input channel).
        conv_c = cw_ref[c, 0] * patches_ref[0]
        for t in range(1, K):
            conv_c = conv_c + cw_ref[c, t] * patches_ref[t]
        conv_c = jnp.maximum(conv_c + cb_ref[c], 0.0)          # + bias, ReLU
        # fc contribution of channel c: (B, P) x (P, E) on the MXU.
        acc = acc + jnp.dot(conv_c, fcw_ref[c],
                            preferred_element_type=jnp.float32)
    # bn2 (eval, folded; includes fc bias) + ReLU.
    z_ref[...] = jnp.maximum(acc * g2_ref[...] + b2_ref[...], 0.0)


def head_kernel(z_ref, e2_ref, out_ref):
    """Score matmul over one entity tile + sigmoid.

    z: (B, E)   e2 tile: (TILE_N, E)   out tile: (B, TILE_N)
    """
    s = lax.dot_general(z_ref[...], e2_ref[...],
                        dimension_numbers=(((1,), (1,)), ((), ())),
                        preferred_element_type=jnp.float32)
    out_ref[...] = jax.nn.sigmoid(s)


# ------------------------------ JAX wrapper --------------------------------

def conve_forward(E1, R, E2, params, *, d1, d2, wd, C, tile_n=1024):
    B = E1.shape[0]
    H, W = 2 * d1, d2
    ho, wo = H - wd + 1, W - wd + 1
    P, K = ho * wo, wd * wd
    E = d1 * d2
    N = E2.shape[0]
    eps = 1e-5

    # --- layout glue (all tiny tensors, done once per call) ---
    stacked = jnp.concatenate(
        [E1.reshape(B, d1, d2), R.reshape(B, d1, d2)], axis=1)  # (B, 2*d1, d2)
    windows = [stacked[:, ki:ki + ho, kj:kj + wo].reshape(B, P)
               for ki in range(wd) for kj in range(wd)]
    patches = jnp.stack(windows, axis=0)                        # (K, B, P)

    # bn0 (scalar affine, eval mode) folded exactly into conv weights/bias.
    s0 = params["bn0_gamma"][0] / jnp.sqrt(params["bn0_var"][0] + eps)
    b0 = params["bn0_beta"][0] - params["bn0_mean"][0] * s0
    cw = params["conv_w"].reshape(C, K)                         # (C, K)
    cw_f = cw * s0
    cb_f = params["conv_b"] + b0 * jnp.sum(cw, axis=1)          # (C,)

    # fc weights regrouped per conv channel: fc_w is (E, C*P) with feature
    # index f = c*P + p (PyTorch's (C, h, w) flatten order).
    fcw3 = params["fc_w"].reshape(E, C, P).transpose(1, 2, 0)   # (C, P, E)

    # bn2 (eval) folded into scale/shift; fc bias folded into the shift.
    g2 = (params["bn2_gamma"] / jnp.sqrt(params["bn2_var"] + eps)).reshape(1, E)
    shift2 = (params["bn2_beta"].reshape(1, E)
              - params["bn2_mean"].reshape(1, E) * g2)
    b2_f = shift2 + params["fc_b"].reshape(1, E) * g2

    vmem = pl.BlockSpec(memory_space=pltpu.MemorySpace.VMEM)
    smem = pl.BlockSpec(memory_space=pltpu.MemorySpace.SMEM)

    z = pl.pallas_call(
        prologue_kernel,
        out_shape=jax.ShapeDtypeStruct((B, E), jnp.float32),
        in_specs=[vmem, smem, smem, vmem, vmem, vmem],
        out_specs=vmem,
    )(patches, cw_f, cb_f, fcw3, g2, b2_f)                      # (B, E)

    # --- head: score matmul over all entities, tiled (and pipelined) on N ---
    if N <= tile_n:
        tile = N
        n_pad = N
        e2_p = E2
    else:
        tile = tile_n                                           # multiple of 128
        n_pad = ((N + tile - 1) // tile) * tile
        e2_p = jnp.pad(E2, ((0, n_pad - N), (0, 0))) if n_pad != N else E2

    out = pl.pallas_call(
        head_kernel,
        out_shape=jax.ShapeDtypeStruct((B, n_pad), jnp.float32),
        grid=(n_pad // tile,),
        in_specs=[
            pl.BlockSpec((B, E), lambda i: (0, 0)),             # z: resident
            pl.BlockSpec((tile, E), lambda i: (i, 0)),          # E2: streamed
        ],
        out_specs=pl.BlockSpec((B, tile), lambda i: (0, i)),    # lane-dense
        compiler_params=pltpu.CompilerParams(
            dimension_semantics=("parallel",)),
        cost_estimate=pl.CostEstimate(
            flops=2 * B * E * n_pad,
            transcendentals=B * n_pad,
            bytes_accessed=4 * (n_pad * E + B * E + B * n_pad)),
    )(z, e2_p)                                                  # (B, n_pad)

    return out[:, :N] if n_pad != N else out


# ------------------------------ reference ----------------------------------

def conve_reference(E1, R, E2, params, *, d1, d2, wd, C):
    B = E1.shape[0]
    eps = 1e-5
    x = jnp.concatenate([E1.reshape(B, 1, d1, d2),
                         R.reshape(B, 1, d1, d2)], axis=2)      # (B,1,2*d1,d2)
    x = ((x - params["bn0_mean"]) / jnp.sqrt(params["bn0_var"] + eps)
         * params["bn0_gamma"] + params["bn0_beta"])
    y = lax.conv_general_dilated(
        x, params["conv_w"], (1, 1), "VALID",
        dimension_numbers=("NCHW", "OIHW", "NCHW"),
        precision=lax.Precision.HIGHEST)
    y = jax.nn.relu(y + params["conv_b"][None, :, None, None])
    f = y.reshape(B, -1)
    z = jnp.dot(f, params["fc_w"].T,
                precision=lax.Precision.HIGHEST) + params["fc_b"]
    z = ((z - params["bn2_mean"]) / jnp.sqrt(params["bn2_var"] + eps)
         * params["bn2_gamma"] + params["bn2_beta"])
    z = jax.nn.relu(z)
    return jax.nn.sigmoid(jnp.dot(z, E2.T, precision=lax.Precision.HIGHEST))


# --------------------------------- main -------------------------------------

if __name__ == "__main__":
    # Small synthetic config consistent with ConvE.__init__:
    d1, d2 = 4, 8                   # emb_2D_d1, emb_2D_d2
    entity_dim = d1 * d2            # 32 (= relation_dim)
    C = 4                           # num_out_channels
    wd = 3                          # kernel_size
    B = 2                           # batch
    N = 300                         # candidate entities (exercises N tiling/pad)
    ho, wo = 2 * d1 - wd + 1, d2 - wd + 1
    feat_dim = C * ho * wo

    key = jax.random.PRNGKey(0)
    ks = iter(jax.random.split(key, 16))

    E1 = jax.random.normal(next(ks), (B, entity_dim), jnp.float32)
    R = jax.random.normal(next(ks), (B, entity_dim), jnp.float32)
    E2 = jax.random.normal(next(ks), (N, entity_dim), jnp.float32)

    params = {
        "conv_w": jax.random.normal(next(ks), (C, 1, wd, wd), jnp.float32) * 0.1,
        "conv_b": jax.random.normal(next(ks), (C,), jnp.float32) * 0.1,
        "fc_w": jax.random.normal(next(ks), (entity_dim, feat_dim), jnp.float32) * 0.05,
        "fc_b": jax.random.normal(next(ks), (entity_dim,), jnp.float32) * 0.05,
        # BatchNorm eval-mode parameters (non-trivial to exercise the folds).
        "bn0_gamma": 1.0 + 0.1 * jax.random.normal(next(ks), (1,), jnp.float32),
        "bn0_beta": 0.1 * jax.random.normal(next(ks), (1,), jnp.float32),
        "bn0_mean": 0.1 * jax.random.normal(next(ks), (1,), jnp.float32),
        "bn0_var": 0.5 + jnp.abs(jax.random.normal(next(ks), (1,), jnp.float32)),
        "bn2_gamma": 1.0 + 0.1 * jax.random.normal(next(ks), (entity_dim,), jnp.float32),
        "bn2_beta": 0.1 * jax.random.normal(next(ks), (entity_dim,), jnp.float32),
        "bn2_mean": 0.1 * jax.random.normal(next(ks), (entity_dim,), jnp.float32),
        "bn2_var": 0.5 + jnp.abs(jax.random.normal(next(ks), (entity_dim,), jnp.float32)),
    }
    # TODO(synk): Dropout + training-mode BatchNorm batch statistics are
    # stochastic / batch-dependent; eval-mode semantics are implemented.

    # tile_n=128 keeps the toy problem small while exercising the N grid,
    # pipelining and the pad-and-slice path (production default is 1024).
    out = conve_forward(E1, R, E2, params, d1=d1, d2=d2, wd=wd, C=C, tile_n=128)
    out = jax.block_until_ready(out)

    ref = conve_reference(E1, R, E2, params, d1=d1, d2=d2, wd=wd, C=C)
    ref = jax.block_until_ready(ref)

    assert out.shape == (B, N), out.shape
    assert jnp.allclose(out, ref, rtol=2e-3, atol=2e-3), (
        f"max abs diff {jnp.max(jnp.abs(out - ref))}")

    print("KERNEL_OK")
</pallas_src>

<mosaic_0001>
module attributes {stable_mosaic.version = 11 : i64} {
  func.func @prologue_kernel(%arg0: memref<9x2x36xf32, #tpu.memory_space<vmem>>, %arg1: memref<4x9xf32, #tpu.memory_space<smem>>, %arg2: memref<4xf32, #tpu.memory_space<smem>>, %arg3: memref<4x36x32xf32, #tpu.memory_space<vmem>>, %arg4: memref<1x32xf32, #tpu.memory_space<vmem>>, %arg5: memref<1x32xf32, #tpu.memory_space<vmem>>, %arg6: memref<2x32xf32, #tpu.memory_space<vmem>>) attributes {dimension_semantics = [], scalar_prefetch = 0 : i64, scratch_operands = 0 : i64, tpu.core_type = #tpu.core_type<tc>} {
    %cst = arith.constant 0.000000e+00 : f32
    %0 = vector.broadcast %cst : f32 to vector<2x32xf32>
    %c0 = arith.constant 0 : index
    %c0_0 = arith.constant 0 : index
    %1 = memref.load %arg1[%c0, %c0_0] : memref<4x9xf32, #tpu.memory_space<smem>>
    %c0_1 = arith.constant 0 : index
    %c0_2 = arith.constant 0 : index
    %c0_3 = arith.constant 0 : index
    %2 = vector.load %arg0[%c0_1, %c0_2, %c0_3] : memref<9x2x36xf32, #tpu.memory_space<vmem>>, vector<1x2x36xf32>
    %3 = vector.shape_cast %2 : vector<1x2x36xf32> to vector<2x36xf32>
    %4 = vector.broadcast %1 : f32 to vector<2x36xf32>
    %5 = arith.mulf %4, %3 : vector<2x36xf32>
    %c0_4 = arith.constant 0 : index
    %c1 = arith.constant 1 : index
    %6 = memref.load %arg1[%c0_4, %c1] : memref<4x9xf32, #tpu.memory_space<smem>>
    %c1_5 = arith.constant 1 : index
    %c0_6 = arith.constant 0 : index
    %c0_7 = arith.constant 0 : index
    %7 = vector.load %arg0[%c1_5, %c0_6, %c0_7] : memref<9x2x36xf32, #tpu.memory_space<vmem>>, vector<1x2x36xf32>
    %8 = vector.shape_cast %7 : vector<1x2x36xf32> to vector<2x36xf32>
    %9 = vector.broadcast %6 : f32 to vector<2x36xf32>
    %10 = arith.mulf %9, %8 : vector<2x36xf32>
    %11 = arith.addf %5, %10 : vector<2x36xf32>
    %c0_8 = arith.constant 0 : index
    %c2 = arith.constant 2 : index
    %12 = memref.load %arg1[%c0_8, %c2] : memref<4x9xf32, #tpu.memory_space<smem>>
    %c2_9 = arith.constant 2 : index
    %c0_10 = arith.constant 0 : index
    %c0_11 = arith.constant 0 : index
    %13 = vector.load %arg0[%c2_9, %c0_10, %c0_11] : memref<9x2x36xf32, #tpu.memory_space<vmem>>, vector<1x2x36xf32>
    %14 = vector.shape_cast %13 : vector<1x2x36xf32> to vector<2x36xf32>
    %15 = vector.broadcast %12 : f32 to vector<2x36xf32>
    %16 = arith.mulf %15, %14 : vector<2x36xf32>
    %17 = arith.addf %11, %16 : vector<2x36xf32>
    %c0_12 = arith.constant 0 : index
    %c3 = arith.constant 3 : index
    %18 = memref.load %arg1[%c0_12, %c3] : memref<4x9xf32, #tpu.memory_space<smem>>
    %c3_13 = arith.constant 3 : index
    %c0_14 = arith.constant 0 : index
    %c0_15 = arith.constant 0 : index
    %19 = vector.load %arg0[%c3_13, %c0_14, %c0_15] : memref<9x2x36xf32, #tpu.memory_space<vmem>>, vector<1x2x36xf32>
    %20 = vector.shape_cast %19 : vector<1x2x36xf32> to vector<2x36xf32>
    %21 = vector.broadcast %18 : f32 to vector<2x36xf32>
    %22 = arith.mulf %21, %20 : vector<2x36xf32>
    %23 = arith.addf %17, %22 : vector<2x36xf32>
    %c0_16 = arith.constant 0 : index
    %c4 = arith.constant 4 : index
    %24 = memref.load %arg1[%c0_16, %c4] : memref<4x9xf32, #tpu.memory_space<smem>>
    %c4_17 = arith.constant 4 : index
    %c0_18 = arith.constant 0 : index
    %c0_19 = arith.constant 0 : index
    %25 = vector.load %arg0[%c4_17, %c0_18, %c0_19] : memref<9x2x36xf32, #tpu.memory_space<vmem>>, vector<1x2x36xf32>
    %26 = vector.shape_cast %25 : vector<1x2x36xf32> to vector<2x36xf32>
    %27 = vector.broadcast %24 : f32 to vector<2x36xf32>
    %28 = arith.mulf %27, %26 : vector<2x36xf32>
    %29 = arith.addf %23, %28 : vector<2x36xf32>
    %c0_20 = arith.constant 0 : index
    %c5 = arith.constant 5 : index
    %30 = memref.load %arg1[%c0_20, %c5] : memref<4x9xf32, #tpu.memory_space<smem>>
    %c5_21 = arith.constant 5 : index
    %c0_22 = arith.constant 0 : index
    %c0_23 = arith.constant 0 : index
    %31 = vector.load %arg0[%c5_21, %c0_22, %c0_23] : memref<9x2x36xf32, #tpu.memory_space<vmem>>, vector<1x2x36xf32>
    %32 = vector.shape_cast %31 : vector<1x2x36xf32> to vector<2x36xf32>
    %33 = vector.broadcast %30 : f32 to vector<2x36xf32>
    %34 = arith.mulf %33, %32 : vector<2x36xf32>
    %35 = arith.addf %29, %34 : vector<2x36xf32>
    %c0_24 = arith.constant 0 : index
    %c6 = arith.constant 6 : index
    %36 = memref.load %arg1[%c0_24, %c6] : memref<4x9xf32, #tpu.memory_space<smem>>
    %c6_25 = arith.constant 6 : index
    %c0_26 = arith.constant 0 : index
    %c0_27 = arith.constant 0 : index
    %37 = vector.load %arg0[%c6_25, %c0_26, %c0_27] : memref<9x2x36xf32, #tpu.memory_space<vmem>>, vector<1x2x36xf32>
    %38 = vector.shape_cast %37 : vector<1x2x36xf32> to vector<2x36xf32>
    %39 = vector.broadcast %36 : f32 to vector<2x36xf32>
    %40 = arith.mulf %39, %38 : vector<2x36xf32>
    %41 = arith.addf %35, %40 : vector<2x36xf32>
    %c0_28 = arith.constant 0 : index
    %c7 = arith.constant 7 : index
    %42 = memref.load %arg1[%c0_28, %c7] : memref<4x9xf32, #tpu.memory_space<smem>>
    %c7_29 = arith.constant 7 : index
    %c0_30 = arith.constant 0 : index
    %c0_31 = arith.constant 0 : index
    %43 = vector.load %arg0[%c7_29, %c0_30, %c0_31] : memref<9x2x36xf32, #tpu.memory_space<vmem>>, vector<1x2x36xf32>
    %44 = vector.shape_cast %43 : vector<1x2x36xf32> to vector<2x36xf32>
    %45 = vector.broadcast %42 : f32 to vector<2x36xf32>
    %46 = arith.mulf %45, %44 : vector<2x36xf32>
    %47 = arith.addf %41, %46 : vector<2x36xf32>
    %c0_32 = arith.constant 0 : index
    %c8 = arith.constant 8 : index
    %48 = memref.load %arg1[%c0_32, %c8] : memref<4x9xf32, #tpu.memory_space<smem>>
    %c8_33 = arith.constant 8 : index
    %c0_34 = arith.constant 0 : index
    %c0_35 = arith.constant 0 : index
    %49 = vector.load %arg0[%c8_33, %c0_34, %c0_35] : memref<9x2x36xf32, #tpu.memory_space<vmem>>, vector<1x2x36xf32>
    %50 = vector.shape_cast %49 : vector<1x2x36xf32> to vector<2x36xf32>
    %51 = vector.broadcast %48 : f32 to vector<2x36xf32>
    %52 = arith.mulf %51, %50 : vector<2x36xf32>
    %53 = arith.addf %47, %52 : vector<2x36xf32>
    %c0_36 = arith.constant 0 : index
    %54 = memref.load %arg2[%c0_36] : memref<4xf32, #tpu.memory_space<smem>>
    %55 = vector.broadcast %54 : f32 to vector<2x36xf32>
    %56 = arith.addf %53, %55 : vector<2x36xf32>
    %cst_37 = arith.constant 0.000000e+00 : f32
    %57 = vector.broadcast %cst_37 : f32 to vector<2x36xf32>
    %58 = arith.maximumf %56, %57 : vector<2x36xf32>
    %c0_38 = arith.constant 0 : index
    %c0_39 = arith.constant 0 : index
    %c0_40 = arith.constant 0 : index
    %59 = vector.load %arg3[%c0_38, %c0_39, %c0_40] : memref<4x36x32xf32, #tpu.memory_space<vmem>>, vector<1x36x32xf32>
    %60 = vector.shape_cast %59 : vector<1x36x32xf32> to vector<36x32xf32>
    %cst_41 = arith.constant dense<0.000000e+00> : vector<2x32xf32>
    %61 = tpu.matmul %58, %60, %cst_41 {dimension_numbers = #tpu.dot_dimension_numbers<[1], [0], [0], [1], [0, 0, 1, 1], [], []>} : vector<2x36xf32>, vector<36x32xf32>, vector<2x32xf32> -> vector<2x32xf32>
    %62 = arith.addf %0, %61 : vector<2x32xf32>
    %c1_42 = arith.constant 1 : index
    %c0_43 = arith.constant 0 : index
    %63 = memref.load %arg1[%c1_42, %c0_43] : memref<4x9xf32, #tpu.memory_space<smem>>
    %c0_44 = arith.constant 0 : index
    %c0_45 = arith.constant 0 : index
    %c0_46 = arith.constant 0 : index
    %64 = vector.load %arg0[%c0_44, %c0_45, %c0_46] : memref<9x2x36xf32, #tpu.memory_space<vmem>>, vector<1x2x36xf32>
    %65 = vector.shape_cast %64 : vector<1x2x36xf32> to vector<2x36xf32>
    %66 = vector.broadcast %63 : f32 to vector<2x36xf32>
    %67 = arith.mulf %66, %65 : vector<2x36xf32>
    %c1_47 = arith.constant 1 : index
    %c1_48 = arith.constant 1 : index
    %68 = memref.load %arg1[%c1_47, %c1_48] : memref<4x9xf32, #tpu.memory_space<smem>>
    %c1_49 = arith.constant 1 : index
    %c0_50 = arith.constant 0 : index
    %c0_51 = arith.constant 0 : index
    %69 = vector.load %arg0[%c1_49, %c0_50, %c0_51] : memref<9x2x36xf32, #tpu.memory_space<vmem>>, vector<1x2x36xf32>
    %70 = vector.shape_cast %69 : vector<1x2x36xf32> to vector<2x36xf32>
    %71 = vector.broadcast %68 : f32 to vector<2x36xf32>
    %72 = arith.mulf %71, %70 : vector<2x36xf32>
    %73 = arith.addf %67, %72 : vector<2x36xf32>
    %c1_52 = arith.constant 1 : index
    %c2_53 = arith.constant 2 : index
    %74 = memref.load %arg1[%c1_52, %c2_53] : memref<4x9xf32, #tpu.memory_space<smem>>
    %c2_54 = arith.constant 2 : index
    %c0_55 = arith.constant 0 : index
    %c0_56 = arith.constant 0 : index
    %75 = vector.load %arg0[%c2_54, %c0_55, %c0_56] : memref<9x2x36xf32, #tpu.memory_space<vmem>>, vector<1x2x36xf32>
    %76 = vector.shape_cast %75 : vector<1x2x36xf32> to vector<2x36xf32>
    %77 = vector.broadcast %74 : f32 to vector<2x36xf32>
    %78 = arith.mulf %77, %76 : vector<2x36xf32>
    %79 = arith.addf %73, %78 : vector<2x36xf32>
    %c1_57 = arith.constant 1 : index
    %c3_58 = arith.constant 3 : index
    %80 = memref.load %arg1[%c1_57, %c3_58] : memref<4x9xf32, #tpu.memory_space<smem>>
    %c3_59 = arith.constant 3 : index
    %c0_60 = arith.constant 0 : index
    %c0_61 = arith.constant 0 : index
    %81 = vector.load %arg0[%c3_59, %c0_60, %c0_61] : memref<9x2x36xf32, #tpu.memory_space<vmem>>, vector<1x2x36xf32>
    %82 = vector.shape_cast %81 : vector<1x2x36xf32> to vector<2x36xf32>
    %83 = vector.broadcast %80 : f32 to vector<2x36xf32>
    %84 = arith.mulf %83, %82 : vector<2x36xf32>
    %85 = arith.addf %79, %84 : vector<2x36xf32>
    %c1_62 = arith.constant 1 : index
    %c4_63 = arith.constant 4 : index
    %86 = memref.load %arg1[%c1_62, %c4_63] : memref<4x9xf32, #tpu.memory_space<smem>>
    %c4_64 = arith.constant 4 : index
    %c0_65 = arith.constant 0 : index
    %c0_66 = arith.constant 0 : index
    %87 = vector.load %arg0[%c4_64, %c0_65, %c0_66] : memref<9x2x36xf32, #tpu.memory_space<vmem>>, vector<1x2x36xf32>
    %88 = vector.shape_cast %87 : vector<1x2x36xf32> to vector<2x36xf32>
    %89 = vector.broadcast %86 : f32 to vector<2x36xf32>
    %90 = arith.mulf %89, %88 : vector<2x36xf32>
    %91 = arith.addf %85, %90 : vector<2x36xf32>
    %c1_67 = arith.constant 1 : index
    %c5_68 = arith.constant 5 : index
    %92 = memref.load %arg1[%c1_67, %c5_68] : memref<4x9xf32, #tpu.memory_space<smem>>
    %c5_69 = arith.constant 5 : index
    %c0_70 = arith.constant 0 : index
    %c0_71 = arith.constant 0 : index
    %93 = vector.load %arg0[%c5_69, %c0_70, %c0_71] : memref<9x2x36xf32, #tpu.memory_space<vmem>>, vector<1x2x36xf32>
    %94 = vector.shape_cast %93 : vector<1x2x36xf32> to vector<2x36xf32>
    %95 = vector.broadcast %92 : f32 to vector<2x36xf32>
    %96 = arith.mulf %95, %94 : vector<2x36xf32>
    %97 = arith.addf %91, %96 : vector<2x36xf32>
    %c1_72 = arith.constant 1 : index
    %c6_73 = arith.constant 6 : index
    %98 = memref.load %arg1[%c1_72, %c6_73] : memref<4x9xf32, #tpu.memory_space<smem>>
    %c6_74 = arith.constant 6 : index
    %c0_75 = arith.constant 0 : index
    %c0_76 = arith.constant 0 : index
    %99 = vector.load %arg0[%c6_74, %c0_75, %c0_76] : memref<9x2x36xf32, #tpu.memory_space<vmem>>, vector<1x2x36xf32>
    %100 = vector.shape_cast %99 : vector<1x2x36xf32> to vector<2x36xf32>
    %101 = vector.broadcast %98 : f32 to vector<2x36xf32>
    %102 = arith.mulf %101, %100 : vector<2x36xf32>
    %103 = arith.addf %97, %102 : vector<2x36xf32>
    %c1_77 = arith.constant 1 : index
    %c7_78 = arith.constant 7 : index
    %104 = memref.load %arg1[%c1_77, %c7_78] : memref<4x9xf32, #tpu.memory_space<smem>>
    %c7_79 = arith.constant 7 : index
    %c0_80 = arith.constant 0 : index
    %c0_81 = arith.constant 0 : index
    %105 = vector.load %arg0[%c7_79, %c0_80, %c0_81] : memref<9x2x36xf32, #tpu.memory_space<vmem>>, vector<1x2x36xf32>
    %106 = vector.shape_cast %105 : vector<1x2x36xf32> to vector<2x36xf32>
    %107 = vector.broadcast %104 : f32 to vector<2x36xf32>
    %108 = arith.mulf %107, %106 : vector<2x36xf32>
    %109 = arith.addf %103, %108 : vector<2x36xf32>
    %c1_82 = arith.constant 1 : index
    %c8_83 = arith.constant 8 : index
    %110 = memref.load %arg1[%c1_82, %c8_83] : memref<4x9xf32, #tpu.memory_space<smem>>
    %c8_84 = arith.constant 8 : index
    %c0_85 = arith.constant 0 : index
    %c0_86 = arith.constant 0 : index
    %111 = vector.load %arg0[%c8_84, %c0_85, %c0_86] : memref<9x2x36xf32, #tpu.memory_space<vmem>>, vector<1x2x36xf32>
    %112 = vector.shape_cast %111 : vector<1x2x36xf32> to vector<2x36xf32>
    %113 = vector.broadcast %110 : f32 to vector<2x36xf32>
    %114 = arith.mulf %113, %112 : vector<2x36xf32>
    %115 = arith.addf %109, %114 : vector<2x36xf32>
    %c1_87 = arith.constant 1 : index
    %116 = memref.load %arg2[%c1_87] : memref<4xf32, #tpu.memory_space<smem>>
    %117 = vector.broadcast %116 : f32 to vector<2x36xf32>
    %118 = arith.addf %115, %117 : vector<2x36xf32>
    %cst_88 = arith.constant 0.000000e+00 : f32
    %119 = vector.broadcast %cst_88 : f32 to vector<2x36xf32>
    %120 = arith.maximumf %118, %119 : vector<2x36xf32>
    %c1_89 = arith.constant 1 : index
    %c0_90 = arith.constant 0 : index
    %c0_91 = arith.constant 0 : index
    %121 = vector.load %arg3[%c1_89, %c0_90, %c0_91] : memref<4x36x32xf32, #tpu.memory_space<vmem>>, vector<1x36x32xf32>
    %122 = vector.shape_cast %121 : vector<1x36x32xf32> to vector<36x32xf32>
    %cst_92 = arith.constant dense<0.000000e+00> : vector<2x32xf32>
    %123 = tpu.matmul %120, %122, %cst_92 {dimension_numbers = #tpu.dot_dimension_numbers<[1], [0], [0], [1], [0, 0, 1, 1], [], []>} : vector<2x36xf32>, vector<36x32xf32>, vector<2x32xf32> -> vector<2x32xf32>
    %124 = arith.addf %62, %123 : vector<2x32xf32>
    %c2_93 = arith.constant 2 : index
    %c0_94 = arith.constant 0 : index
    %125 = memref.load %arg1[%c2_93, %c0_94] : memref<4x9xf32, #tpu.memory_space<smem>>
    %c0_95 = arith.constant 0 : index
    %c0_96 = arith.constant 0 : index
    %c0_97 = arith.constant 0 : index
    %126 = vector.load %arg0[%c0_95, %c0_96, %c0_97] : memref<9x2x36xf32, #tpu.memory_space<vmem>>, vector<1x2x36xf32>
    %127 = vector.shape_cast %126 : vector<1x2x36xf32> to vector<2x36xf32>
    %128 = vector.broadcast %125 : f32 to vector<2x36xf32>
    %129 = arith.mulf %128, %127 : vector<2x36xf32>
    %c2_98 = arith.constant 2 : index
    %c1_99 = arith.constant 1 : index
    %130 = memref.load %arg1[%c2_98, %c1_99] : memref<4x9xf32, #tpu.memory_space<smem>>
    %c1_100 = arith.constant 1 : index
    %c0_101 = arith.constant 0 : index
    %c0_102 = arith.constant 0 : index
    %131 = vector.load %arg0[%c1_100, %c0_101, %c0_102] : memref<9x2x36xf32, #tpu.memory_space<vmem>>, vector<1x2x36xf32>
    %132 = vector.shape_cast %131 : vector<1x2x36xf32> to vector<2x36xf32>
    %133 = vector.broadcast %130 : f32 to vector<2x36xf32>
    %134 = arith.mulf %133, %132 : vector<2x36xf32>
    %135 = arith.addf %129, %134 : vector<2x36xf32>
    %c2_103 = arith.constant 2 : index
    %c2_104 = arith.constant 2 : index
    %136 = memref.load %arg1[%c2_103, %c2_104] : memref<4x9xf32, #tpu.memory_space<smem>>
    %c2_105 = arith.constant 2 : index
    %c0_106 = arith.constant 0 : index
    %c0_107 = arith.constant 0 : index
    %137 = vector.load %arg0[%c2_105, %c0_106, %c0_107] : memref<9x2x36xf32, #tpu.memory_space<vmem>>, vector<1x2x36xf32>
    %138 = vector.shape_cast %137 : vector<1x2x36xf32> to vector<2x36xf32>
    %139 = vector.broadcast %136 : f32 to vector<2x36xf32>
    %140 = arith.mulf %139, %138 : vector<2x36xf32>
    %141 = arith.addf %135, %140 : vector<2x36xf32>
    %c2_108 = arith.constant 2 : index
    %c3_109 = arith.constant 3 : index
    %142 = memref.load %arg1[%c2_108, %c3_109] : memref<4x9xf32, #tpu.memory_space<smem>>
    %c3_110 = arith.constant 3 : index
    %c0_111 = arith.constant 0 : index
    %c0_112 = arith.constant 0 : index
    %143 = vector.load %arg0[%c3_110, %c0_111, %c0_112] : memref<9x2x36xf32, #tpu.memory_space<vmem>>, vector<1x2x36xf32>
    %144 = vector.shape_cast %143 : vector<1x2x36xf32> to vector<2x36xf32>
    %145 = vector.broadcast %142 : f32 to vector<2x36xf32>
    %146 = arith.mulf %145, %144 : vector<2x36xf32>
    %147 = arith.addf %141, %146 : vector<2x36xf32>
    %c2_113 = arith.constant 2 : index
    %c4_114 = arith.constant 4 : index
    %148 = memref.load %arg1[%c2_113, %c4_114] : memref<4x9xf32, #tpu.memory_space<smem>>
    %c4_115 = arith.constant 4 : index
    %c0_116 = arith.constant 0 : index
    %c0_117 = arith.constant 0 : index
    %149 = vector.load %arg0[%c4_115, %c0_116, %c0_117] : memref<9x2x36xf32, #tpu.memory_space<vmem>>, vector<1x2x36xf32>
    %150 = vector.shape_cast %149 : vector<1x2x36xf32> to vector<2x36xf32>
    %151 = vector.broadcast %148 : f32 to vector<2x36xf32>
    %152 = arith.mulf %151, %150 : vector<2x36xf32>
    %153 = arith.addf %147, %152 : vector<2x36xf32>
    %c2_118 = arith.constant 2 : index
    %c5_119 = arith.constant 5 : index
    %154 = memref.load %arg1[%c2_118, %c5_119] : memref<4x9xf32, #tpu.memory_space<smem>>
    %c5_120 = arith.constant 5 : index
    %c0_121 = arith.constant 0 : index
    %c0_122 = arith.constant 0 : index
    %155 = vector.load %arg0[%c5_120, %c0_121, %c0_122] : memref<9x2x36xf32, #tpu.memory_space<vmem>>, vector<1x2x36xf32>
    %156 = vector.shape_cast %155 : vector<1x2x36xf32> to vector<2x36xf32>
    %157 = vector.broadcast %154 : f32 to vector<2x36xf32>
    %158 = arith.mulf %157, %156 : vector<2x36xf32>
    %159 = arith.addf %153, %158 : vector<2x36xf32>
    %c2_123 = arith.constant 2 : index
    %c6_124 = arith.constant 6 : index
    %160 = memref.load %arg1[%c2_123, %c6_124] : memref<4x9xf32, #tpu.memory_space<smem>>
    %c6_125 = arith.constant 6 : index
    %c0_126 = arith.constant 0 : index
    %c0_127 = arith.constant 0 : index
    %161 = vector.load %arg0[%c6_125, %c0_126, %c0_127] : memref<9x2x36xf32, #tpu.memory_space<vmem>>, vector<1x2x36xf32>
    %162 = vector.shape_cast %161 : vector<1x2x36xf32> to vector<2x36xf32>
    %163 = vector.broadcast %160 : f32 to vector<2x36xf32>
    %164 = arith.mulf %163, %162 : vector<2x36xf32>
    %165 = arith.addf %159, %164 : vector<2x36xf32>
    %c2_128 = arith.constant 2 : index
    %c7_129 = arith.constant 7 : index
    %166 = memref.load %arg1[%c2_128, %c7_129] : memref<4x9xf32, #tpu.memory_space<smem>>
    %c7_130 = arith.constant 7 : index
    %c0_131 = arith.constant 0 : index
    %c0_132 = arith.constant 0 : index
    %167 = vector.load %arg0[%c7_130, %c0_131, %c0_132] : memref<9x2x36xf32, #tpu.memory_space<vmem>>, vector<1x2x36xf32>
    %168 = vector.shape_cast %167 : vector<1x2x36xf32> to vector<2x36xf32>
    %169 = vector.broadcast %166 : f32 to vector<2x36xf32>
    %170 = arith.mulf %169, %168 : vector<2x36xf32>
    %171 = arith.addf %165, %170 : vector<2x36xf32>
    %c2_133 = arith.constant 2 : index
    %c8_134 = arith.constant 8 : index
    %172 = memref.load %arg1[%c2_133, %c8_134] : memref<4x9xf32, #tpu.memory_space<smem>>
    %c8_135 = arith.constant 8 : index
    %c0_136 = arith.constant 0 : index
    %c0_137 = arith.constant 0 : index
    %173 = vector.load %arg0[%c8_135, %c0_136, %c0_137] : memref<9x2x36xf32, #tpu.memory_space<vmem>>, vector<1x2x36xf32>
    %174 = vector.shape_cast %173 : vector<1x2x36xf32> to vector<2x36xf32>
    %175 = vector.broadcast %172 : f32 to vector<2x36xf32>
    %176 = arith.mulf %175, %174 : vector<2x36xf32>
    %177 = arith.addf %171, %176 : vector<2x36xf32>
    %c2_138 = arith.constant 2 : index
    %178 = memref.load %arg2[%c2_138] : memref<4xf32, #tpu.memory_space<smem>>
    %179 = vector.broadcast %178 : f32 to vector<2x36xf32>
    %180 = arith.addf %177, %179 : vector<2x36xf32>
    %cst_139 = arith.constant 0.000000e+00 : f32
    %181 = vector.broadcast %cst_139 : f32 to vector<2x36xf32>
    %182 = arith.maximumf %180, %181 : vector<2x36xf32>
    %c2_140 = arith.constant 2 : index
    %c0_141 = arith.constant 0 : index
    %c0_142 = arith.constant 0 : index
    %183 = vector.load %arg3[%c2_140, %c0_141, %c0_142] : memref<4x36x32xf32, #tpu.memory_space<vmem>>, vector<1x36x32xf32>
    %184 = vector.shape_cast %183 : vector<1x36x32xf32> to vector<36x32xf32>
    %cst_143 = arith.constant dense<0.000000e+00> : vector<2x32xf32>
    %185 = tpu.matmul %182, %184, %cst_143 {dimension_numbers = #tpu.dot_dimension_numbers<[1], [0], [0], [1], [0, 0, 1, 1], [], []>} : vector<2x36xf32>, vector<36x32xf32>, vector<2x32xf32> -> vector<2x32xf32>
    %186 = arith.addf %124, %185 : vector<2x32xf32>
    %c3_144 = arith.constant 3 : index
    %c0_145 = arith.constant 0 : index
    %187 = memref.load %arg1[%c3_144, %c0_145] : memref<4x9xf32, #tpu.memory_space<smem>>
    %c0_146 = arith.constant 0 : index
    %c0_147 = arith.constant 0 : index
    %c0_148 = arith.constant 0 : index
    %188 = vector.load %arg0[%c0_146, %c0_147, %c0_148] : memref<9x2x36xf32, #tpu.memory_space<vmem>>, vector<1x2x36xf32>
    %189 = vector.shape_cast %188 : vector<1x2x36xf32> to vector<2x36xf32>
    %190 = vector.broadcast %187 : f32 to vector<2x36xf32>
    %191 = arith.mulf %190, %189 : vector<2x36xf32>
    %c3_149 = arith.constant 3 : index
    %c1_150 = arith.constant 1 : index
    %192 = memref.load %arg1[%c3_149, %c1_150] : memref<4x9xf32, #tpu.memory_space<smem>>
    %c1_151 = arith.constant 1 : index
    %c0_152 = arith.constant 0 : index
    %c0_153 = arith.constant 0 : index
    %193 = vector.load %arg0[%c1_151, %c0_152, %c0_153] : memref<9x2x36xf32, #tpu.memory_space<vmem>>, vector<1x2x36xf32>
    %194 = vector.shape_cast %193 : vector<1x2x36xf32> to vector<2x36xf32>
    %195 = vector.broadcast %192 : f32 to vector<2x36xf32>
    %196 = arith.mulf %195, %194 : vector<2x36xf32>
    %197 = arith.addf %191, %196 : vector<2x36xf32>
    %c3_154 = arith.constant 3 : index
    %c2_155 = arith.constant 2 : index
    %198 = memref.load %arg1[%c3_154, %c2_155] : memref<4x9xf32, #tpu.memory_space<smem>>
    %c2_156 = arith.constant 2 : index
    %c0_157 = arith.constant 0 : index
    %c0_158 = arith.constant 0 : index
    %199 = vector.load %arg0[%c2_156, %c0_157, %c0_158] : memref<9x2x36xf32, #tpu.memory_space<vmem>>, vector<1x2x36xf32>
    %200 = vector.shape_cast %199 : vector<1x2x36xf32> to vector<2x36xf32>
    %201 = vector.broadcast %198 : f32 to vector<2x36xf32>
    %202 = arith.mulf %201, %200 : vector<2x36xf32>
    %203 = arith.addf %197, %202 : vector<2x36xf32>
    %c3_159 = arith.constant 3 : index
    %c3_160 = arith.constant 3 : index
    %204 = memref.load %arg1[%c3_159, %c3_160] : memref<4x9xf32, #tpu.memory_space<smem>>
    %c3_161 = arith.constant 3 : index
    %c0_162 = arith.constant 0 : index
    %c0_163 = arith.constant 0 : index
    %205 = vector.load %arg0[%c3_161, %c0_162, %c0_163] : memref<9x2x36xf32, #tpu.memory_space<vmem>>, vector<1x2x36xf32>
    %206 = vector.shape_cast %205 : vector<1x2x36xf32> to vector<2x36xf32>
    %207 = vector.broadcast %204 : f32 to vector<2x36xf32>
    %208 = arith.mulf %207, %206 : vector<2x36xf32>
    %209 = arith.addf %203, %208 : vector<2x36xf32>
    %c3_164 = arith.constant 3 : index
    %c4_165 = arith.constant 4 : index
    %210 = memref.load %arg1[%c3_164, %c4_165] : memref<4x9xf32, #tpu.memory_space<smem>>
    %c4_166 = arith.constant 4 : index
    %c0_167 = arith.constant 0 : index
    %c0_168 = arith.constant 0 : index
    %211 = vector.load %arg0[%c4_166, %c0_167, %c0_168] : memref<9x2x36xf32, #tpu.memory_space<vmem>>, vector<1x2x36xf32>
    %212 = vector.shape_cast %211 : vector<1x2x36xf32> to vector<2x36xf32>
    %213 = vector.broadcast %210 : f32 to vector<2x36xf32>
    %214 = arith.mulf %213, %212 : vector<2x36xf32>
    %215 = arith.addf %209, %214 : vector<2x36xf32>
    %c3_169 = arith.constant 3 : index
    %c5_170 = arith.constant 5 : index
    %216 = memref.load %arg1[%c3_169, %c5_170] : memref<4x9xf32, #tpu.memory_space<smem>>
    %c5_171 = arith.constant 5 : index
    %c0_172 = arith.constant 0 : index
    %c0_173 = arith.constant 0 : index
    %217 = vector.load %arg0[%c5_171, %c0_172, %c0_173] : memref<9x2x36xf32, #tpu.memory_space<vmem>>, vector<1x2x36xf32>
    %218 = vector.shape_cast %217 : vector<1x2x36xf32> to vector<2x36xf32>
    %219 = vector.broadcast %216 : f32 to vector<2x36xf32>
    %220 = arith.mulf %219, %218 : vector<2x36xf32>
    %221 = arith.addf %215, %220 : vector<2x36xf32>
    %c3_174 = arith.constant 3 : index
    %c6_175 = arith.constant 6 : index
    %222 = memref.load %arg1[%c3_174, %c6_175] : memref<4x9xf32, #tpu.memory_space<smem>>
    %c6_176 = arith.constant 6 : index
    %c0_177 = arith.constant 0 : index
    %c0_178 = arith.constant 0 : index
    %223 = vector.load %arg0[%c6_176, %c0_177, %c0_178] : memref<9x2x36xf32, #tpu.memory_space<vmem>>, vector<1x2x36xf32>
    %224 = vector.shape_cast %223 : vector<1x2x36xf32> to vector<2x36xf32>
    %225 = vector.broadcast %222 : f32 to vector<2x36xf32>
    %226 = arith.mulf %225, %224 : vector<2x36xf32>
    %227 = arith.addf %221, %226 : vector<2x36xf32>
    %c3_179 = arith.constant 3 : index
    %c7_180 = arith.constant 7 : index
    %228 = memref.load %arg1[%c3_179, %c7_180] : memref<4x9xf32, #tpu.memory_space<smem>>
    %c7_181 = arith.constant 7 : index
    %c0_182 = arith.constant 0 : index
    %c0_183 = arith.constant 0 : index
    %229 = vector.load %arg0[%c7_181, %c0_182, %c0_183] : memref<9x2x36xf32, #tpu.memory_space<vmem>>, vector<1x2x36xf32>
    %230 = vector.shape_cast %229 : vector<1x2x36xf32> to vector<2x36xf32>
    %231 = vector.broadcast %228 : f32 to vector<2x36xf32>
    %232 = arith.mulf %231, %230 : vector<2x36xf32>
    %233 = arith.addf %227, %232 : vector<2x36xf32>
    %c3_184 = arith.constant 3 : index
    %c8_185 = arith.constant 8 : index
    %234 = memref.load %arg1[%c3_184, %c8_185] : memref<4x9xf32, #tpu.memory_space<smem>>
    %c8_186 = arith.constant 8 : index
    %c0_187 = arith.constant 0 : index
    %c0_188 = arith.constant 0 : index
    %235 = vector.load %arg0[%c8_186, %c0_187, %c0_188] : memref<9x2x36xf32, #tpu.memory_space<vmem>>, vector<1x2x36xf32>
    %236 = vector.shape_cast %235 : vector<1x2x36xf32> to vector<2x36xf32>
    %237 = vector.broadcast %234 : f32 to vector<2x36xf32>
    %238 = arith.mulf %237, %236 : vector<2x36xf32>
    %239 = arith.addf %233, %238 : vector<2x36xf32>
    %c3_189 = arith.constant 3 : index
    %240 = memref.load %arg2[%c3_189] : memref<4xf32, #tpu.memory_space<smem>>
    %241 = vector.broadcast %240 : f32 to vector<2x36xf32>
    %242 = arith.addf %239, %241 : vector<2x36xf32>
    %cst_190 = arith.constant 0.000000e+00 : f32
    %243 = vector.broadcast %cst_190 : f32 to vector<2x36xf32>
    %244 = arith.maximumf %242, %243 : vector<2x36xf32>
    %c3_191 = arith.constant 3 : index
    %c0_192 = arith.constant 0 : index
    %c0_193 = arith.constant 0 : index
    %245 = vector.load %arg3[%c3_191, %c0_192, %c0_193] : memref<4x36x32xf32, #tpu.memory_space<vmem>>, vector<1x36x32xf32>
    %246 = vector.shape_cast %245 : vector<1x36x32xf32> to vector<36x32xf32>
    %cst_194 = arith.constant dense<0.000000e+00> : vector<2x32xf32>
    %247 = tpu.matmul %244, %246, %cst_194 {dimension_numbers = #tpu.dot_dimension_numbers<[1], [0], [0], [1], [0, 0, 1, 1], [], []>} : vector<2x36xf32>, vector<36x32xf32>, vector<2x32xf32> -> vector<2x32xf32>
    %248 = arith.addf %186, %247 : vector<2x32xf32>
    %c0_195 = arith.constant 0 : index
    %c0_196 = arith.constant 0 : index
    %249 = vector.load %arg4[%c0_195, %c0_196] : memref<1x32xf32, #tpu.memory_space<vmem>>, vector<1x32xf32>
    %250 = vector.broadcast %249 : vector<1x32xf32> to vector<2x32xf32>
    %251 = arith.mulf %248, %250 : vector<2x32xf32>
    %c0_197 = arith.constant 0 : index
    %c0_198 = arith.constant 0 : index
    %252 = vector.load %arg5[%c0_197, %c0_198] : memref<1x32xf32, #tpu.memory_space<vmem>>, vector<1x32xf32>
    %253 = vector.broadcast %252 : vector<1x32xf32> to vector<2x32xf32>
    %254 = arith.addf %251, %253 : vector<2x32xf32>
    %cst_199 = arith.constant 0.000000e+00 : f32
    %255 = vector.broadcast %cst_199 : f32 to vector<2x32xf32>
    %256 = arith.maximumf %254, %255 : vector<2x32xf32>
    %c0_200 = arith.constant 0 : index
    %c0_201 = arith.constant 0 : index
    %257 = vector.load %arg6[%c0_200, %c0_201] : memref<2x32xf32, #tpu.memory_space<vmem>>, vector<2x32xf32>
    tpu.vector_store %arg6[%c0_200, %c0_201], %256 {strides = array<i32>} : memref<2x32xf32, #tpu.memory_space<vmem>>, vector<2x32xf32>,
    return
  }
}

</mosaic_0001>

<bundles_post_ra>
// kernel: tpu_custom_call.1
= control target key start
LH: loop header
LB: loop body
LE: loop exit
PB: predicated region body
PF: predicated region fallthrough
CT: control target
= control target key end

     0   :  { %11 = vsyncpa [#allocation4], 0  ;;  %s1176_s0 = inlined_call_operand.vmem [shape: f32[9,2,36], index: 0, kind: input, shape index: {}]   ;;  %s1177_s1 = inlined_call_operand.vmem [shape: f32[4,9], index: 1, kind: input, shape index: {}]   ;;  %s1178_s2 = inlined_call_operand.vmem [shape: f32[4], index: 2, kind: input, shape index: {}]   ;;  %s1179_s3 = inlined_call_operand.vmem [shape: f32[4,36,32], index: 3, kind: input, shape index: {}]   ;;  %s1180_s4 = inlined_call_operand.vmem [shape: f32[1,32], index: 4, kind: input, shape index: {}]   ;;  %s1181_s5 = inlined_call_operand.vmem [shape: f32[1,32], index: 5, kind: input, shape index: {}]   ;;  %s1182_s6 = inlined_call_operand.hbm [shape: f32[2,32], index: 6, kind: output, shape index: {}]  }
   0x1   :  { %12 = vsyncpa [#allocation6], 0 }
   0x2   :  { %13 = vsyncpa [#allocation3], 0  ;;  %s22_s23 = sshll.u32 %s1177_s1, 4  ;;  %s32_s26 = sshll.u32 %s1178_s2, 4  ;;  %s23_s23 = int_to_ptr.vmem [resolvable:$true] %s22_s23  ;;  %s33_s26 = int_to_ptr.vmem [resolvable:$true] %s32_s26 }
   0x3   :  { %s770_s27 = scalar_lea.vmem %s23_s23, 64  ;;  %p775_p1 = scmp.lt.s32.totalorder %s23_s23, %s23_s23 }
   0x4   :  { %p771_p0 = scmp.ne.s32.totalorder %s23_s23, %s770_s27  ;;  %p776_p2 = scmp.lt.s32.totalorder %s770_s27, %s770_s27 }
   0x6   :  { %p777_p3 = por %p776_p2, %p775_p1 }
   0x8   :  { %p778_p4 = pnand %p777_p3, %p771_p0 }
   0xa   :  { %781 = shalt.err (!%p778_p4)
}
   0xb   :  { %s822_s28 = smov [#allocation2]   ;;  %s782_s29 = scalar_lea.vmem %s33_s26, 16 }
   0xc   :  { %25 = dma.vmem_to_smem %s23_s23, 64, %s822_s28, [#allocation4]  }
   0xd   :  { %p783_p5 = scmp.ne.s32.totalorder %s33_s26, %s782_s29  ;;  %p787_p6 = scmp.lt.s32.totalorder %s33_s26, %s33_s26 }
   0xe   :  { %p788_p7 = scmp.lt.s32.totalorder %s782_s29, %s782_s29 }
  0x10   :  { %p789_p8 = por %p788_p7, %p787_p6 }
  0x12   :  { %p790_p9 = pnand %p789_p8, %p783_p5 }
  0x14   :  { %793 = shalt.err (!%p790_p9)
}
  0x15   :  { %s823_s1 = smov [#allocation5]  }
  0x16   :  { %35 = dma.vmem_to_smem %s33_s26, 16, %s823_s1, [#allocation6]  }
  0x17   :  { %816 = dma.done.wait [#allocation4], 64  }
  0x18   :  { %817 = vsyncadd [#allocation4], 4294967232 }
  0x19   :  { %818 = dma.done.wait [#allocation6], 16  }
  0x1a   :  { %819 = vsyncadd [#allocation6], 4294967280 }
  0x1b   :  { %48 = sfence }
  0x1c   :  { %v614_v0 = vld [vmem:[%s1179_s3 + $0x28] sm:$0xff]  ;;  %v615_v1 = vld [vmem:[%s1179_s3 + $0x30] sm:$0xff]  ;;  %v824_v3 = vmov 0.0|0.0   ;;  %v634_v5 = vld [vmem:[%s1179_s3 + $0x58] sm:$0xff]  ;;  %s604_s17 = sld [smem:[#allocation2 + $0x80]]  ;;  %vm825_vm0 = vmmov 0  }
  0x1d   :  { %v633_v2 = vld [vmem:[%s1179_s3 + $0x50] sm:$0xff]  ;;  %735 = vmatprep.subr.bf16.mxu1 %v824_v3  ;;  %747 = vmatprep.subr.bf16.mxu0 %v824_v3  ;;  %v736_v4 = vpack.c.bf16 %v615_v1, %v614_v0  ;;  %v616_v6 = vld [vmem:[%s1179_s3 + $0x38] sm:$0xff]  ;;  %v617_v7 = vld [vmem:[%s1179_s3 + $0x40] sm:$0xff]  ;;  %v826_v11 = vmov 0.0   ;;  %s605_s22 = sld [smem:[#allocation2 + $0x81]]  ;;  %vm159_vm1 = vcmask 1043456  }
  0x1e   :  { %v748_v8 = vpack.c.bf16 %v634_v5, %v633_v2  ;;  %v635_v9 = vld [vmem:[%s1179_s3 + $0x60] sm:$0xff]  ;;  %v636_v10 = vld [vmem:[%s1179_s3 + $0x68] sm:$0xff]  ;;  %693 = vmatprep.mubr.msk.f32.mxu1 %vm825_vm0, %v826_v11  ;;  %719 = vmatprep.mubr.msk.f32.mxu0 %vm825_vm0, %v826_v11  ;;  %v739_v12 = vpack.c.bf16 %v617_v7, %v616_v6  ;;  %s914_s29 = sld [smem:[#allocation2 + $0x82]]  ;;  %s916_s1 = sld [smem:[#allocation2 + $0x83]]  ;;  %v637_v17 = vld [vmem:[%s1179_s3 + $0x70] sm:$0xf] }
  0x1f   :  { %737 = vmatpush3.bf16.msra.mxu1 %v736_v4  ;;  %v751_v13 = vpack.c.bf16 %v636_v10, %v635_v9  ;;  %v904_v14 = vld [vmem:[%s1176_s0] sm:$0x3]  ;;  %v618_v15 = vld [vmem:[%s1179_s3 + $0x48] sm:$0xf]  ;;  %v912_v16 = vld [vmem:[%s1176_s0 + $0x2] sm:$0x3] }
  0x20   :  { %749 = vmatpush3.bf16.msra.mxu0 %v748_v8  ;;  %738 = vmatprep.subr.bf16.mxu1 %v824_v3  ;;  %s921_s7 = sld [smem:[#allocation2 + $0x84]]  ;;  %s923_s8 = sld [smem:[#allocation2 + $0x85]]  ;;  %v929_v19 = vld [vmem:[%s1176_s0 + $0x4] sm:$0x3]  ;;  %v940_v22 = vld [vmem:[%s1176_s0 + $0x6] sm:$0x3] }
  0x21   :  { %750 = vmatprep.subr.bf16.mxu0 %v824_v3  ;;  %s932_s11 = sld [smem:[#allocation2 + $0x86]]  ;;  %s934_s12 = sld [smem:[#allocation2 + $0x87]]  ;;  %v950_v24 = vld [vmem:[%s1176_s0 + $0x8] sm:$0x3]  ;;  %v960_v26 = vld [vmem:[%s1179_s3] sm:$0xff]  ;;  %vm155_vm2 = vcmask 293888  }
  0x22   :  { %v111_v18 = vstv %s604_s17  ;;  %s943_s15 = sld [smem:[#allocation2 + $0x88]]  ;;  %s945_s16 = sld [smem:[#allocation5 + $0x1]]  ;;  %v965_v27 = vld [vmem:[%s1179_s3 + $0x8] sm:$0xff]  ;;  %v1026_v47 = vld [vmem:[%s1176_s0 + $0x10] sm:$0x3]  ;;  %vm570_vm3 = vcmask 254976  }
  0x23   :  { %740 = vmatpush3.bf16.msra.mxu1 %v739_v12  ;;  %v112_v20 = vmul.f32 %v111_v18, %v904_v14  ;;  %v114_v21 = vstv %s605_s22  ;;  %s952_s19 = sld [smem:[#allocation2 + $0x100]]  ;;  %s954_s20 = sld [smem:[#allocation2 + $0x101]]  ;;  %v976_v28 = vld [vmem:[%s1176_s0 + $0xa] sm:$0x3]  ;;  %v988_v31 = vld [vmem:[%s1176_s0 + $0xc] sm:$0x3]  ;;  %v742_v37 = vpack.c.bf16 %v965_v27, %v960_v26 }
  0x24   :  { %752 = vmatpush3.bf16.msra.mxu0 %v751_v13  ;;  %691 = vmatprep.subr.mxu1 %v826_v11  ;;  %v115_v23 = vmul.f32 %v912_v16, %v114_v21  ;;  %s967_s25 = sld [smem:[#allocation2 + $0x102]]  ;;  %s969_s26 = sld [smem:[#allocation2 + $0x103]]  ;;  %v118_v29 = vstv %s914_s29  ;;  %v122_v30 = vstv %s916_s1  ;;  %v1013_v42 = vld [vmem:[%s1176_s0 + $0xe] sm:$0x3] }
  0x25   :  { %717 = vmatprep.subr.mxu0 %v826_v11  ;;  %s980_s2 = sld [smem:[#allocation2 + $0x104]]  ;;  %s982_s30 = sld [smem:[#allocation2 + $0x105]]  ;;  %v119_v32 = vmul.f32 %v929_v19, %v118_v29  ;;  %v123_v33 = vmul.f32 %v940_v22, %v122_v30  ;;  %v652_v27 = vld [vmem:[%s1179_s3 + $0x88] sm:$0xff] }
  0x26   :  { %v116_v25 = vadd.f32 %v115_v23, %v112_v20  ;;  %v126_v34 = vstv %s921_s7  ;;  %v130_v35 = vstv %s923_s8  ;;  %s994_s29 = sld [smem:[#allocation2 + $0x106]]  ;;  %s996_s1 = sld [smem:[#allocation2 + $0x107]] }
  0x27   :  { %692 = vmatpush3.msk.msra.mxu1 %vm159_vm1, %v618_v15  ;;  %v134_v36 = vstv %s932_s11  ;;  %s1001_s13 = sld [smem:[#allocation2 + $0x108]]  ;;  %v127_v39 = vmul.f32 %v950_v24, %v126_v34  ;;  %v131_v40 = vmul.f32 %v976_v28, %v130_v35  ;;  %v138_v41 = vstv %s934_s12  ;;  %s1008_s8 = sld [smem:[#allocation2 + $0x1]] }
  0x28   :  { %718 = vmatpush3.msk.msra.mxu0 %vm159_vm1, %v637_v17  ;;  %741 = vmatprep.subr.bf16.mxu1 %v824_v3  ;;  %v120_v38 = vadd.f32 %v119_v32, %v116_v25  ;;  %s1006_s7 = sld [smem:[#allocation2]]  ;;  %v135_v43 = vmul.f32 %v988_v31, %v134_v36  ;;  %v142_v44 = vstv %s943_s15  ;;  %s1019_s11 = sld [smem:[#allocation2 + $0x2]]  ;;  %v139_v57 = vmul.f32 %v1013_v42, %v138_v41 }
  0x29   :  { %753 = vmatprep.subr.bf16.mxu0 %v824_v3  ;;  %v310_v45 = vstv %s952_s19  ;;  %v313_v46 = vstv %s954_s20  ;;  %s1021_s12 = sld [smem:[#allocation2 + $0x3]]  ;;  %s1031_s15 = sld [smem:[#allocation2 + $0x4]]  ;;  %v143_v60 = vmul.f32 %v1026_v47, %v142_v44  ;;  %v146_v61 = vstv %s945_s16 }
  0x2a   :  { %v124_v48 = vadd.f32 %v123_v33, %v120_v38  ;;  %v311_v49 = vmul.f32 %v310_v45, %v904_v14  ;;  %v314_v50 = vmul.f32 %v912_v16, %v313_v46  ;;  %v317_v51 = vstv %s967_s25  ;;  %s1033_s19 = sld [smem:[#allocation2 + $0x5]]  ;;  %s1039_s0 = sld [smem:[#allocation2 + $0x6]] }
  0x2b   :  { %v318_v52 = vmul.f32 %v929_v19, %v317_v51  ;;  %v321_v53 = vstv %s969_s26  ;;  %v325_v54 = vstv %s980_s2  ;;  %v329_v55 = vstv %s982_s30  ;;  %s1047_s20 = sld [smem:[#allocation5 + $0x2]]  ;;  %s1049_s22 = sld [smem:[#allocation2 + $0x180]] }
  0x2c   :  { %v128_v56 = vadd.f32 %v127_v39, %v124_v48  ;;  %v315_v58 = vadd.f32 %v314_v50, %v311_v49  ;;  %v322_v59 = vmul.f32 %v940_v22, %v321_v53  ;;  %v326_v62 = vmul.f32 %v950_v24, %v325_v54  ;;  %s1053_s23 = sld [smem:[#allocation2 + $0x7]]  ;;  %s1055_s24 = sld [smem:[#allocation2 + $0x8]] }
  0x2d   :  { %v333_v63 = vstv %s994_s29  ;;  %v330_v2 = vmul.f32 %v976_v28, %v329_v55  ;;  %v337_v4 = vstv %s996_s1  ;;  %v341_v6 = vstv %s1001_s13  ;;  %s1061_s16 = sld [smem:[#allocation2 + $0x181]]  ;;  %s1063_s25 = sld [smem:[#allocation2 + $0x182]] }
  0x2e   :  { %v132_v0 = vadd.f32 %v131_v40, %v128_v56  ;;  %v319_v1 = vadd.f32 %v318_v52, %v315_v58  ;;  %v334_v5 = vmul.f32 %v988_v31, %v333_v63  ;;  %v51_v7 = vstv %s1006_s7  ;;  %s1071_s26 = sld [smem:[#allocation2 + $0x183]]  ;;  %s1073_s27 = sld [smem:[#allocation2 + $0x184]]  ;;  %v107_v56 = vld [vmem:[%s1179_s3 + $0x10] sm:$0xff] }
  0x2f   :  { %v56_v8 = vstv %s1008_s8  ;;  %v52_v12 = vmul.f32 %v51_v7, %v904_v14  ;;  %v62_v15 = vstv %s1019_s11  ;;  %v68_v17 = vstv %s1021_s12  ;;  %s1080_s28 = sld [smem:[#allocation2 + $0x185]]  ;;  %s1087_s2 = sld [smem:[#allocation2 + $0x186]] }
  0x30   :  { %v136_v9 = vadd.f32 %v135_v43, %v132_v0  ;;  %v323_v10 = vadd.f32 %v322_v59, %v319_v1  ;;  %v57_v13 = vmul.f32 %v912_v16, %v56_v8  ;;  %v74_v18 = vstv %s1031_s15  ;;  %s1091_s30 = sld [smem:[#allocation5]]  ;;  %s1096_s9 = sld [smem:[#allocation2 + $0x187]]  ;;  %v650_v0 = vld [vmem:[%s1179_s3 + $0x78] sm:$0xff] }
  0x31   :  { %v80_v20 = vstv %s1033_s19  ;;  %v63_v29 = vmul.f32 %v929_v19, %v62_v15  ;;  %v338_v30 = vmul.f32 %v1013_v42, %v337_v4  ;;  %v342_v32 = vmul.f32 %v1026_v47, %v341_v6  ;;  %s1109_s7 = sld [smem:[#allocation2 + $0x188]]  ;;  %s649_s19 = sld [smem:[#allocation5 + $0x3]] }
  0x32   :  { %v140_v21 = vadd.f32 %v139_v57, %v136_v9  ;;  %v327_v23 = vadd.f32 %v326_v62, %v323_v10  ;;  %v58_v25 = vadd.f32 %v57_v13, %v52_v12  ;;  %v69_v33 = vmul.f32 %v940_v22, %v68_v17  ;;  %v108_v57 = vld [vmem:[%s1179_s3 + $0x18] sm:$0xff] }
  0x33   :  { %v86_v34 = vstv %s1039_s0  ;;  %v75_v39 = vmul.f32 %v950_v24, %v74_v18  ;;  %v345_v40 = vstv %s1047_s20  ;;  %v81_v41 = vmul.f32 %v976_v28, %v80_v20 }
  0x34   :  { %v144_v35 = vadd.f32 %v143_v60, %v140_v21  ;;  %v331_v36 = vadd.f32 %v330_v2, %v327_v23  ;;  %v64_v38 = vadd.f32 %v63_v29, %v58_v25  ;;  %v87_v43 = vmul.f32 %v988_v31, %v86_v34 }
  0x35   :  { %v432_v44 = vstv %s1049_s22  ;;  %v92_v49 = vstv %s1053_s23  ;;  %v98_v50 = vstv %s1055_s24  ;;  %v435_v52 = vstv %s1061_s16 }
  0x36   :  { %v147_v45 = vadd.f32 %v146_v61, %v144_v35  ;;  %v335_v46 = vadd.f32 %v334_v5, %v331_v36  ;;  %v70_v48 = vadd.f32 %v69_v33, %v64_v38  ;;  %v433_v51 = vmul.f32 %v432_v44, %v904_v14 }
  0x37   :  { %v439_v53 = vstv %s1063_s25  ;;  %v436_v59 = vmul.f32 %v912_v16, %v435_v52  ;;  %v93_v60 = vmul.f32 %v1013_v42, %v92_v49  ;;  %v443_v61 = vstv %s1071_s26  ;;  %v651_v16 = vld [vmem:[%s1179_s3 + $0x80] sm:$0xff]  ;;  %s827_s26 = smov [#allocation7]  }
  0x38   :  { %v148_v54 = vmax.f32 %v147_v45, 0.0  ;;  %v339_v55 = vadd.f32 %v338_v30, %v335_v46  ;;  %v76_v58 = vadd.f32 %v75_v39, %v70_v48  ;;  %v440_v14 = vmul.f32 %v929_v19, %v439_v53  ;;  %v658_v46 = vld [vmem:[%s1181_s5] ss:$0 sm:$0xff] }
  0x39   :  { %v447_v62 = vstv %s1073_s27  ;;  %v437_v2 = vadd.f32 %v436_v59, %v433_v51  ;;  %v444_v19 = vmul.f32 %v940_v22, %v443_v61  ;;  %v745_v4 = vpack.c.bf16 %v108_v57, %v107_v56  ;;  %s578_s27 = sshll.u32 %s827_s26, 4  ;;  %s579_s27 = int_to_ptr.vmem [resolvable:$true] %s578_s27 }
  0x3a   :  { %694 = vmatmul.mubr.msk.f32.vlgmr.msra.gmra.mrb[0].mxu1 %vm155_vm2, %v148_v54  ;;  %v343_v63 = vadd.f32 %v342_v32, %v339_v55  ;;  %v82_v1 = vadd.f32 %v81_v41, %v76_v58  ;;  %v99_v5 = vmul.f32 %v1026_v47, %v98_v50  ;;  %v451_v6 = vstv %s1080_s28  ;;  %s794_s28 = scalar_lea.vmem %s579_s27, 32  ;;  %p799_p11 = scmp.lt.s32.totalorder %s579_s27, %s579_s27 }
  0x3b   :  { %743 = vmatpush3.bf16.msra.mxu1 %v742_v37  ;;  %706 = vmatprep.mubr.msk.f32.mxu1 %vm825_vm0, %v826_v11  ;;  %v441_v9 = vadd.f32 %v440_v14, %v437_v2  ;;  %v448_v22 = vmul.f32 %v950_v24, %v447_v62  ;;  %v754_v10 = vpack.c.bf16 %v651_v16, %v650_v0  ;;  %v455_v12 = vstv %s1087_s2  ;;  %v653_v37 = vld [vmem:[%s1179_s3 + $0x90] sm:$0xff]  ;;  %v109_v24 = vld [vmem:[%s1179_s3 + $0x20] sm:$0xf]  ;;  %p795_p10 = scmp.ne.s32.totalorder %s579_s27, %s794_s28  ;;  %p800_p12 = scmp.lt.s32.totalorder %s794_s28, %s794_s28 }
  0x3c   :  { %v346_v7 = vadd.f32 %v345_v40, %v343_v63  ;;  %744 = vmatprep.subr.bf16.mxu1 %v824_v3  ;;  %v88_v8 = vadd.f32 %v87_v43, %v82_v1  ;;  %v452_v17 = vmul.f32 %v976_v28, %v451_v6  ;;  %v102_v18 = vstv %s1091_s30 }
  0x3d   :  { %v445_v15 = vadd.f32 %v444_v19, %v441_v9  ;;  %v459_v20 = vstv %s1096_s9  ;;  %v456_v25 = vmul.f32 %v988_v31, %v455_v12  ;;  %v757_v29 = vpack.c.bf16 %v653_v37, %v652_v27  ;;  %v654_v31 = vld [vmem:[%s1179_s3 + $0x98] sm:$0xf]  ;;  %p801_p13 = por %p800_p12, %p799_p11 }
  0x3e   :  { %v347_v26 = vmax.f32 %v346_v7, 0.0  ;;  %v94_v13 = vadd.f32 %v93_v60, %v88_v8  ;;  %v463_v28 = vstv %s1109_s7  ;;  %v460_v33 = vmul.f32 %v1013_v42, %v459_v20 }
  0x3f   :  { %746 = vmatpush3.bf16.msra.mxu1 %v745_v4  ;;  %v449_v23 = vadd.f32 %v448_v22, %v445_v15  ;;  %v464_v36 = vmul.f32 %v1026_v47, %v463_v28  ;;  %v467_v38 = vstv %s649_s19  ;;  %p802_p0 = pnand %p801_p13, %p795_p10 }
  0x40   :  { %720 = vmatmul.mubr.msk.f32.vlgmr.msra.gmra.mrb[0].mxu0 %vm155_vm2, %v347_v26  ;;  %704 = vmatprep.subr.mxu1 %v826_v11  ;;  %v100_v21 = vadd.f32 %v99_v5, %v94_v13 }
  0x41   :  { %755 = vmatpush3.bf16.msra.mxu0 %v754_v10  ;;  %732 = vmatprep.mubr.msk.f32.mxu0 %vm825_vm0, %v826_v11  ;;  %v453_v32 = vadd.f32 %v452_v17, %v449_v23 }
  0x42   :  { %756 = vmatprep.subr.bf16.mxu0 %v824_v3  ;;  %v103_v30 = vadd.f32 %v102_v18, %v100_v21 }
  0x43   :  { %705 = vmatpush3.msk.msra.mxu1 %vm159_vm1, %v109_v24  ;;  %v457_v35 = vadd.f32 %v456_v25, %v453_v32 }
  0x44   :  { %v104_v34 = vmax.f32 %v103_v30, 0.0 }
  0x45   :  { %758 = vmatpush3.bf16.msra.mxu0 %v757_v29  ;;  %v461_v3 = vadd.f32 %v460_v33, %v457_v35 }
  0x46   :  { %730 = vmatprep.subr.mxu0 %v826_v11  ;;  %707 = vmatmul.mubr.msk.f32.vlgmr.msra.gmra.mrb[0].mxu1 %vm155_vm2, %v104_v34  ;;  %v657_v11 = vld [vmem:[%s1180_s4] ss:$0 sm:$0xff] }
  0x47   :  { %v465_v39 = vadd.f32 %v464_v36, %v461_v3 }
  0x49   :  { %731 = vmatpush3.msk.msra.mxu0 %vm159_vm1, %v654_v31  ;;  %v468_v42 = vadd.f32 %v467_v38, %v465_v39 }
  0x4b   :  { %v469_v40 = vmax.f32 %v468_v42, 0.0 }
  0x4d   :  { %733 = vmatmul.mubr.msk.f32.vlgmr.msra.gmra.mrb[0].mxu0 %vm155_vm2, %v469_v40 }
 0x119   :  { %v305_v41 = vpop.f32.mrb[0].mxu1 }
 0x11a   :  { %v708_v47 = vpop.f32.mrb[1].mxu1 }
 0x120   :  { %v548_v43 = vpop.f32.mrb[0].mxu0 }
 0x121   :  { %v759_v44 = vadd.f32 %v548_v43, %v305_v41  ;;  %v734_v45 = vpop.f32.mrb[1].mxu0 }
 0x123   :  { %v560_v48 = vmul.f32 %v759_v44, %v657_v11 }
 0x125   :  { %v568_v49 = vadd.f32 %v658_v46, %v560_v48 }
 0x127   :  { %v569_v50 = vmax.f32 %v568_v49, 0.0 }
 0x129   :  { %571 = vst.msk [vmem:[#allocation7] sm:$0x3] %vm570_vm3, %v569_v50 }
 0x12a   :  { %805 = shalt.err (!%p802_p0)
}
 0x12b   :  { %s806_s30 = scalar_lea.hbm %s1182_s6, 32 }
 0x12c   :  { %p807_p1 = scmp.ne.s32.totalorder %s1182_s6, %s806_s30  ;;  %p810_p2 = scmp.lt.u32.totalorder %s806_s30, %s1182_s6 }
 0x12e   :  { %p812_p3 = pnand %p810_p2, %p807_p1 }
 0x130   :  { %815 = shalt.err (!%p812_p3)
}
 0x131   :  { %581 = dma.vmem_to_hbm [thread:$0]  %s579_s27, 32, %s1182_s6, [#allocation3]  }
 0x132   :  { %820 = dma.done.wait [#allocation3], 32  }
 0x133   :  { %821 = vsyncadd [#allocation3], 4294967264 }
 0x134   :  { %585 = vsyncpa [#allocation3], 1 }
 0x135   :  { %586 = vsyncpa [#allocation4], 1 }
 0x136   :  { %587 = vsyncpa [#allocation6], 1 }

</bundles_post_ra>
